<compile_context>
chip_gen: v7x
topology: tpu7x:2x2x1
jax: 0.10.0
libtpu: 0.0.40
codegen_flags: <defaults>
</compile_context>

<pallas_src>
import jax
import jax.numpy as jnp
from jax.experimental import pallas as pl
from jax.experimental.pallas import tpu as pltpu


def _round_up(x, m):
    return (x + m - 1) // m * m


def mlp_oto_kernel(x_ref, w1_ref, b1_ref, w2_ref, b2_ref, w3_ref, b3_ref, o_ref):
    # x_ref: (TB, Fp) bf16 ; w1: (Fp, Hp) bf16 ; b1: (1, Hp) f32
    # w2: (Hp, Hp) bf16 ; b2: (1, Hp) f32 ; w3: (1, Hp) f32 row
    # b3: (1, 1) f32 scalar in SMEM ; o: (1, TB) f32 lane-dense.
    h1 = jnp.dot(x_ref[...], w1_ref[...],
                 preferred_element_type=jnp.float32) + b1_ref[...]
    h1 = jnp.maximum(h1, 0.0)

    h2 = jnp.dot(h1.astype(w2_ref.dtype), w2_ref[...],
                 preferred_element_type=jnp.float32) + b2_ref[...]
    h2 = jnp.maximum(h2, 0.0)

    # Final Linear(H, 1): VPU multiply + lane reduction (XLU slot), feeding a
    # lane-dense row of TB outputs instead of a (TB, 1) masked store.
    out = jnp.sum(h2 * w3_ref[...], axis=-1) + b3_ref[0, 0]      # (TB,)
    o_ref[...] = out[None, :].astype(o_ref.dtype)                # (1, TB) store


def prepare_kernel_params(params, compute_dtype=jnp.bfloat16):
    """One-time weight prep: fold the OneToOne scale into W1, zero-pad F/H up to
    multiples of 128 lanes, and cast matmul weights to the compute dtype."""
    w_oto = params["w_oto"]                  # (1, F)
    w1, b1 = params["w1"], params["b1"]      # (F, H), (1, H)
    w2, b2 = params["w2"], params["b2"]      # (H, H), (1, H)
    w3, b3 = params["w3"], params["b3"]      # (H, 1), (1, 1)
    F, H = w1.shape
    Fp, Hp = _round_up(F, 128), _round_up(H, 128)

    w1 = w1 * w_oto.T                        # fold elementwise scale (exact)
    w1p = jnp.pad(w1, ((0, Fp - F), (0, Hp - H))).astype(compute_dtype)
    b1p = jnp.pad(b1, ((0, 0), (0, Hp - H))).astype(jnp.float32)
    w2p = jnp.pad(w2, ((0, Hp - H), (0, Hp - H))).astype(compute_dtype)
    b2p = jnp.pad(b2, ((0, 0), (0, Hp - H))).astype(jnp.float32)
    w3p = jnp.pad(w3.T, ((0, 0), (0, Hp - H))).astype(jnp.float32)   # (1, Hp) row
    b3p = b3.astype(jnp.float32)                                      # (1, 1)
    return dict(F=F, H=H, Fp=Fp, Hp=Hp,
                w1=w1p, b1=b1p, w2=w2p, b2=b2p, w3=w3p, b3=b3p,
                compute_dtype=compute_dtype)


def mlp_oto_forward(x, kp, *, block_b=512):
    """x: (B, F) float32; kp: output of prepare_kernel_params. Returns (B, 1)."""
    B, F = x.shape
    assert F == kp["F"]
    Fp, Hp = kp["Fp"], kp["Hp"]
    compute_dtype = kp["compute_dtype"]

    # Batch tile: multiple of 128 (lane-dense output tile), capped at block_b.
    TB = _round_up(min(block_b, _round_up(B, 128)), 128)
    Bp = _round_up(B, TB)
    xp = jnp.pad(x, ((0, Bp - B), (0, Fp - F))).astype(compute_dtype)

    weight_keys = ("w1", "b1", "w2", "b2", "w3", "b3")
    bytes_accessed = (
        xp.size * xp.dtype.itemsize
        + sum(kp[k].size * kp[k].dtype.itemsize for k in weight_keys)
        + Bp * 4)

    out = pl.pallas_call(
        mlp_oto_kernel,
        out_shape=jax.ShapeDtypeStruct((1, Bp), jnp.float32),
        grid=(Bp // TB,),
        in_specs=[
            pl.BlockSpec((TB, Fp), lambda i: (i, 0)),          # x: streamed over batch
            pl.BlockSpec((Fp, Hp), lambda i: (0, 0)),          # w1: resident in VMEM
            pl.BlockSpec((1, Hp), lambda i: (0, 0)),           # b1: resident
            pl.BlockSpec((Hp, Hp), lambda i: (0, 0)),          # w2: resident
            pl.BlockSpec((1, Hp), lambda i: (0, 0)),           # b2: resident
            pl.BlockSpec((1, Hp), lambda i: (0, 0)),           # w3 row: resident
            pl.BlockSpec(memory_space=pltpu.MemorySpace.SMEM), # b3 scalar in SMEM
        ],
        out_specs=pl.BlockSpec((1, TB), lambda i: (0, i)),     # lane-dense output slab
        compiler_params=pltpu.CompilerParams(
            dimension_semantics=("parallel",),  # shard batch grid across TCs (v7x)
            vmem_limit_bytes=64 * 1024 * 1024,
        ),
        cost_estimate=pl.CostEstimate(
            flops=2 * Bp * (Fp * Hp + Hp * Hp + Hp),
            transcendentals=0,
            bytes_accessed=bytes_accessed,
        ),
    )(xp, kp["w1"], kp["b1"], kp["w2"], kp["b2"], kp["w3"], kp["b3"])

    return out[0, :B][:, None]                                 # back to (B, 1)


def init_params(key, feature_number):
    F = feature_number
    H = 2 * F
    ks = jax.random.split(key, 7)
    # OneToOneLayer.weights ~ randn(1, F)
    w_oto = jax.random.normal(ks[0], (1, F), jnp.float32)

    # nn.Linear default init: U(-1/sqrt(fan_in)); stored transposed (in, out).
    def linear(kw, kb, fan_in, fan_out):
        bound = 1.0 / jnp.sqrt(fan_in)
        w = jax.random.uniform(kw, (fan_in, fan_out), jnp.float32, -bound, bound)
        b = jax.random.uniform(kb, (1, fan_out), jnp.float32, -bound, bound)
        return w, b

    w1, b1 = linear(ks[1], ks[2], F, H)
    w2, b2 = linear(ks[3], ks[4], H, H)
    w3, b3 = linear(ks[5], ks[6], H, 1)
    return dict(w_oto=w_oto, w1=w1, b1=b1, w2=w2, b2=b2, w3=w3, b3=b3)


def reference_forward(x, p):
    # Pure fp32 reference matching the PyTorch module semantics.
    h = x * p["w_oto"]
    h = jnp.maximum(h @ p["w1"] + p["b1"], 0.0)
    h = jnp.maximum(h @ p["w2"] + p["b2"], 0.0)
    return h @ p["w3"] + p["b3"]


if __name__ == "__main__":
    key = jax.random.PRNGKey(0)
    kx, kparam = jax.random.split(key)
    batch, feature_number = 8, 32
    x = jax.random.normal(kx, (batch, feature_number), jnp.float32)
    params = init_params(kparam, feature_number)
    kparams = prepare_kernel_params(params, compute_dtype=jnp.bfloat16)

    out = mlp_oto_forward(x, kparams)
    out = jax.block_until_ready(out)

    ref = reference_forward(x, params)
    assert out.shape == (batch, 1)
    # bf16 matmul operands (fp32 accumulation) vs fp32 reference -> modest tolerance.
    assert jnp.allclose(out, ref, atol=2e-2, rtol=2e-2), (
        f"max abs err {float(jnp.max(jnp.abs(out - ref)))}")
    print("KERNEL_OK")
</pallas_src>

<mosaic_0001>
module attributes {stable_mosaic.version = 11 : i64} {
  func.func @mlp_oto_kernel(%arg0: i32, %arg1: memref<128x128xbf16, #tpu.memory_space<vmem>>, %arg2: memref<128x128xbf16, #tpu.memory_space<vmem>>, %arg3: memref<1x128xf32, #tpu.memory_space<vmem>>, %arg4: memref<128x128xbf16, #tpu.memory_space<vmem>>, %arg5: memref<1x128xf32, #tpu.memory_space<vmem>>, %arg6: memref<1x128xf32, #tpu.memory_space<vmem>>, %arg7: memref<1x1xf32, #tpu.memory_space<smem>>, %arg8: memref<1x128xf32, #tpu.memory_space<vmem>>) attributes {dimension_semantics = [#tpu.dimension_semantics<parallel>], iteration_bounds = array<i64: 1>, scalar_prefetch = 0 : i64, scratch_operands = 0 : i64, tpu.core_type = #tpu.core_type<tc>, window_params = [{transform_indices = @transform_0, window_bounds = array<i64: 128, 128>}, {pipeline_mode = #tpu.pipeline_mode<synchronous>, transform_indices = @transform_1, window_bounds = array<i64: 128, 128>}, {pipeline_mode = #tpu.pipeline_mode<synchronous>, transform_indices = @transform_2, window_bounds = array<i64: 1, 128>}, {pipeline_mode = #tpu.pipeline_mode<synchronous>, transform_indices = @transform_3, window_bounds = array<i64: 128, 128>}, {pipeline_mode = #tpu.pipeline_mode<synchronous>, transform_indices = @transform_4, window_bounds = array<i64: 1, 128>}, {pipeline_mode = #tpu.pipeline_mode<synchronous>, transform_indices = @transform_5, window_bounds = array<i64: 1, 128>}, {transform_indices = @transform_6, window_bounds = array<i64: 1, 1>}, {transform_indices = @transform_7, window_bounds = array<i64: 1, 128>}]} {
    %c0 = arith.constant 0 : index
    %c0_0 = arith.constant 0 : index
    %0 = vector.load %arg1[%c0, %c0_0] : memref<128x128xbf16, #tpu.memory_space<vmem>>, vector<128x128xbf16>
    %c0_1 = arith.constant 0 : index
    %c0_2 = arith.constant 0 : index
    %1 = vector.load %arg2[%c0_1, %c0_2] : memref<128x128xbf16, #tpu.memory_space<vmem>>, vector<128x128xbf16>
    %cst = arith.constant dense<0.000000e+00> : vector<128x128xf32>
    %2 = tpu.matmul %0, %1, %cst {dimension_numbers = #tpu.dot_dimension_numbers<[1], [0], [0], [1], [0, 0, 1, 1], [], []>} : vector<128x128xbf16>, vector<128x128xbf16>, vector<128x128xf32> -> vector<128x128xf32>
    %c0_3 = arith.constant 0 : index
    %c0_4 = arith.constant 0 : index
    %3 = vector.load %arg3[%c0_3, %c0_4] : memref<1x128xf32, #tpu.memory_space<vmem>>, vector<1x128xf32>
    %4 = vector.broadcast %3 : vector<1x128xf32> to vector<128x128xf32>
    %5 = arith.addf %2, %4 : vector<128x128xf32>
    %cst_5 = arith.constant 0.000000e+00 : f32
    %6 = vector.broadcast %cst_5 : f32 to vector<128x128xf32>
    %7 = arith.maximumf %5, %6 : vector<128x128xf32>
    %8 = arith.truncf %7 : vector<128x128xf32> to vector<128x128xbf16>
    %c0_6 = arith.constant 0 : index
    %c0_7 = arith.constant 0 : index
    %9 = vector.load %arg4[%c0_6, %c0_7] : memref<128x128xbf16, #tpu.memory_space<vmem>>, vector<128x128xbf16>
    %cst_8 = arith.constant dense<0.000000e+00> : vector<128x128xf32>
    %10 = tpu.matmul %8, %9, %cst_8 {dimension_numbers = #tpu.dot_dimension_numbers<[1], [0], [0], [1], [0, 0, 1, 1], [], []>} : vector<128x128xbf16>, vector<128x128xbf16>, vector<128x128xf32> -> vector<128x128xf32>
    %c0_9 = arith.constant 0 : index
    %c0_10 = arith.constant 0 : index
    %11 = vector.load %arg5[%c0_9, %c0_10] : memref<1x128xf32, #tpu.memory_space<vmem>>, vector<1x128xf32>
    %12 = vector.broadcast %11 : vector<1x128xf32> to vector<128x128xf32>
    %13 = arith.addf %10, %12 : vector<128x128xf32>
    %cst_11 = arith.constant 0.000000e+00 : f32
    %14 = vector.broadcast %cst_11 : f32 to vector<128x128xf32>
    %15 = arith.maximumf %13, %14 : vector<128x128xf32>
    %c0_12 = arith.constant 0 : index
    %c0_13 = arith.constant 0 : index
    %16 = vector.load %arg6[%c0_12, %c0_13] : memref<1x128xf32, #tpu.memory_space<vmem>>, vector<1x128xf32>
    %17 = vector.broadcast %16 : vector<1x128xf32> to vector<128x128xf32>
    %18 = arith.mulf %15, %17 : vector<128x128xf32>
    %cst_14 = arith.constant dense<0.000000e+00> : vector<128xf32>
    %19 = vector.multi_reduction <add>, %18, %cst_14 [1] : vector<128x128xf32> to vector<128xf32>
    %c0_15 = arith.constant 0 : index
    %c0_16 = arith.constant 0 : index
    %20 = memref.load %arg7[%c0_15, %c0_16] : memref<1x1xf32, #tpu.memory_space<smem>>
    %21 = vector.broadcast %20 : f32 to vector<128xf32>
    %22 = arith.addf %19, %21 : vector<128xf32>
    %23 = vector.shape_cast %22 : vector<128xf32> to vector<1x128xf32>
    %c0_17 = arith.constant 0 : index
    %c0_18 = arith.constant 0 : index
    %24 = vector.load %arg8[%c0_17, %c0_18] : memref<1x128xf32, #tpu.memory_space<vmem>>, vector<1x128xf32>
    tpu.vector_store %arg8[%c0_17, %c0_18], %23 {strides = array<i32>} : memref<1x128xf32, #tpu.memory_space<vmem>>, vector<1x128xf32>,
    return
  }
  func.func @transform_0(%arg0: i32) -> (i32, i32) {
    %c0_i32 = arith.constant 0 : i32
    %c0_i32_0 = arith.constant 0 : i32
    return %arg0, %c0_i32 : i32, i32
  }
  func.func @transform_1(%arg0: i32) -> (i32, i32) {
    %c0_i32 = arith.constant 0 : i32
    %c0_i32_0 = arith.constant 0 : i32
    %c0_i32_1 = arith.constant 0 : i32
    return %c0_i32, %c0_i32_0 : i32, i32
  }
  func.func @transform_2(%arg0: i32) -> (i32, i32) {
    %c0_i32 = arith.constant 0 : i32
    %c0_i32_0 = arith.constant 0 : i32
    %c0_i32_1 = arith.constant 0 : i32
    return %c0_i32, %c0_i32_0 : i32, i32
  }
  func.func @transform_3(%arg0: i32) -> (i32, i32) {
    %c0_i32 = arith.constant 0 : i32
    %c0_i32_0 = arith.constant 0 : i32
    %c0_i32_1 = arith.constant 0 : i32
    return %c0_i32, %c0_i32_0 : i32, i32
  }
  func.func @transform_4(%arg0: i32) -> (i32, i32) {
    %c0_i32 = arith.constant 0 : i32
    %c0_i32_0 = arith.constant 0 : i32
    %c0_i32_1 = arith.constant 0 : i32
    return %c0_i32, %c0_i32_0 : i32, i32
  }
  func.func @transform_5(%arg0: i32) -> (i32, i32) {
    %c0_i32 = arith.constant 0 : i32
    %c0_i32_0 = arith.constant 0 : i32
    %c0_i32_1 = arith.constant 0 : i32
    return %c0_i32, %c0_i32_0 : i32, i32
  }
  func.func @transform_6(%arg0: i32) -> (i32, i32) {
    %c0_i32 = arith.constant 0 : i32
    %c0_i32_0 = arith.constant 0 : i32
    %c0_i32_1 = arith.constant 0 : i32
    return %c0_i32, %c0_i32_0 : i32, i32
  }
  func.func @transform_7(%arg0: i32) -> (i32, i32) {
    %c0_i32 = arith.constant 0 : i32
    %c0_i32_0 = arith.constant 0 : i32
    return %c0_i32, %arg0 : i32, i32
  }
}

</mosaic_0001>

<bundles_post_ra>
// kernel: tpu_custom_call.1
= control target key start
LH: loop header
LB: loop body
LE: loop exit
PB: predicated region body
PF: predicated region fallthrough
CT: control target
= control target key end

     0   :  { %13 = vsyncpa [#allocation4], 0  ;;  %s1331_s0 = inlined_call_operand.hbm [shape: bf16[128,128], index: 0, kind: input, shape index: {}]   ;;  %s1332_s1 = inlined_call_operand.hbm [shape: bf16[128,128], index: 1, kind: input, shape index: {}]   ;;  %s1333_s2 = inlined_call_operand.hbm [shape: f32[1,128], index: 2, kind: input, shape index: {}]   ;;  %s1334_s3 = inlined_call_operand.hbm [shape: bf16[128,128], index: 3, kind: input, shape index: {}]   ;;  %s1335_s4 = inlined_call_operand.hbm [shape: f32[1,128], index: 4, kind: input, shape index: {}]   ;;  %s1336_s5 = inlined_call_operand.hbm [shape: f32[1,128], index: 5, kind: input, shape index: {}]   ;;  %s1337_s6 = inlined_call_operand.<no memory space> [shape: f32[1,1], index: 6, kind: input, shape index: {}]   ;;  %s1338_s7 = inlined_call_operand.hbm [shape: f32[1,128], index: 7, kind: output, shape index: {}]  }
   0x1   :  { %14 = vsyncpa [#allocation7], 0 }
   0x2   :  { %15 = vsyncpa [#allocation10], 0 }
   0x3   :  { %16 = vsyncpa [#allocation13], 0 }
   0x4   :  { %17 = vsyncpa [#allocation5], 0  ;;  %s1085_s24 = smov [#allocation6]   ;;  %s1086_s26 = smov [#allocation9]  }
   0x5   :  { %s35_s25 = sshll.u32 %s1085_s24, 4  ;;  %s57_s27 = sshll.u32 %s1086_s26, 4  ;;  %s36_s25 = int_to_ptr.vmem [resolvable:$true] %s35_s25  ;;  %s1134_s27 = int_to_ptr.vmem [resolvable:$true] %s57_s27 }
   0x6   :  { %s921_s30 = scalar_lea.hbm %s1332_s1, 1024 }
   0x7   :  { %p922_p0 = scmp.ne.s32.totalorder %s1332_s1, %s921_s30  ;;  %p925_p1 = scmp.lt.u32.totalorder %s921_s30, %s1332_s1 }
   0x9   :  { %p927_p2 = pnand %p925_p1, %p922_p0 }
   0xb   :  { %930 = shalt.err (!%p927_p2)
}
   0xc   :  { %s931_s12 = scalar_lea.vmem %s36_s25, 1024  ;;  %p936_p4 = scmp.lt.s32.totalorder %s36_s25, %s36_s25 }
   0xd   :  { %p932_p3 = scmp.ne.s32.totalorder %s36_s25, %s931_s12  ;;  %p937_p5 = scmp.lt.s32.totalorder %s931_s12, %s931_s12 }
   0xf   :  { %p938_p6 = por %p937_p5, %p936_p4 }
  0x11   :  { %p939_p7 = pnand %p938_p6, %p932_p3 }
  0x13   :  { %942 = shalt.err (!%p939_p7)
}
  0x14   :  { %s1087_s13 = smov 64   ;;  %s1088_s14 = smov 4  }
  0x15   :  { %41 = dma.hbm_to_vmem [thread:$0]  %s1332_s1, 1024, %s36_s25, [#allocation7], %s1087_s13, %s1087_s13, %s1088_s14  }
  0x16   :  { %s943_s19 = scalar_lea.hbm %s1334_s3, 1024 }
  0x17   :  { %p944_p8 = scmp.ne.s32.totalorder %s1334_s3, %s943_s19  ;;  %p947_p9 = scmp.lt.u32.totalorder %s943_s19, %s1334_s3 }
  0x19   :  { %p949_p10 = pnand %p947_p9, %p944_p8 }
  0x1b   :  { %952 = shalt.err (!%p949_p10)
}
  0x1c   :  { %s953_s24 = scalar_lea.vmem %s1134_s27, 1024  ;;  %p958_p12 = scmp.lt.s32.totalorder %s1134_s27, %s1134_s27 }
  0x1d   :  { %p954_p11 = scmp.ne.s32.totalorder %s1134_s27, %s953_s24  ;;  %p959_p13 = scmp.lt.s32.totalorder %s953_s24, %s953_s24 }
  0x1f   :  { %p960_p0 = por %p959_p13, %p958_p12 }
  0x21   :  { %p961_p1 = pnand %p960_p0, %p954_p11 }
  0x23   :  { %964 = shalt.err (!%p961_p1)
}
  0x24   :  { %63 = dma.hbm_to_vmem [thread:$0]  %s1334_s3, 1024, %s1134_s27, [#allocation10], %s1087_s13, %s1087_s13, %s1088_s14  }
  0x25   :  { %s1089_s26 = smov [#allocation3]   ;;  %s1090_s29 = smov [#allocation8]  }
  0x26   :  { %s23_s28 = sshll.u32 %s1089_s26, 4  ;;  %s48_s30 = sshll.u32 %s1090_s29, 4  ;;  %s24_s28 = int_to_ptr.vmem [resolvable:$true] %s23_s28  ;;  %s49_s30 = int_to_ptr.vmem [resolvable:$true] %s48_s30 }
  0x27   :  { %s965_s10 = scalar_lea.hbm %s1331_s0, 1024 }
  0x28   :  { %p966_p2 = scmp.ne.s32.totalorder %s1331_s0, %s965_s10  ;;  %p969_p3 = scmp.lt.u32.totalorder %s965_s10, %s1331_s0 }
  0x2a   :  { %p971_p4 = pnand %p969_p3, %p966_p2 }
  0x2c   :  { %974 = shalt.err (!%p971_p4)
}
  0x2d   :  { %s975_s3 = scalar_lea.vmem %s24_s28, 1024  ;;  %p980_p6 = scmp.lt.s32.totalorder %s24_s28, %s24_s28 }
  0x2e   :  { %p976_p5 = scmp.ne.s32.totalorder %s24_s28, %s975_s3  ;;  %p981_p7 = scmp.lt.s32.totalorder %s975_s3, %s975_s3 }
  0x30   :  { %p982_p8 = por %p981_p7, %p980_p6 }
  0x32   :  { %p983_p9 = pnand %p982_p8, %p976_p5 }
  0x34   :  { %986 = shalt.err (!%p983_p9)
}
  0x35   :  { %29 = dma.hbm_to_vmem [thread:$0]  %s1331_s0, 1024, %s24_s28, [#allocation4], %s1087_s13, %s1087_s13, %s1088_s14  }
  0x36   :  { %s987_s20 = scalar_lea.hbm %s1333_s2, 16 }
  0x37   :  { %p988_p10 = scmp.ne.s32.totalorder %s1333_s2, %s987_s20  ;;  %p991_p11 = scmp.lt.u32.totalorder %s987_s20, %s1333_s2 }
  0x39   :  { %p993_p12 = pnand %p991_p11, %p988_p10 }
  0x3b   :  { %996 = shalt.err (!%p993_p12)
}
  0x3c   :  { %s997_s1 = scalar_lea.vmem %s49_s30, 16  ;;  %s1001_s25 = scalar_lea.vmem %s49_s30, 32 }
  0x3d   :  { %p998_p13 = scmp.ne.s32.totalorder %s49_s30, %s997_s1  ;;  %p1002_p0 = scmp.lt.s32.totalorder %s49_s30, %s49_s30 }
  0x3e   :  { %p1003_p1 = scmp.lt.s32.totalorder %s1001_s25, %s997_s1 }
  0x40   :  { %p1004_p2 = por %p1003_p1, %p1002_p0 }
  0x42   :  { %p1005_p3 = pnand %p1004_p2, %p998_p13 }
  0x44   :  { %1008 = shalt.err (!%p1005_p3)
}
  0x45   :  { %51 = dma.hbm_to_vmem [thread:$0]  %s1333_s2, 16, %s49_s30, [#allocation7]  }
  0x46   :  { %s1091_s14 = smov [#allocation11]   ;;  %s1092_s28 = smov [#allocation12]  }
  0x47   :  { %s70_s26 = sshll.u32 %s1091_s14, 4  ;;  %s80_s29 = sshll.u32 %s1092_s28, 4  ;;  %s71_s26 = int_to_ptr.vmem [resolvable:$true] %s70_s26  ;;  %s81_s29 = int_to_ptr.vmem [resolvable:$true] %s80_s29 }
  0x48   :  { %s1009_s10 = scalar_lea.hbm %s1335_s4, 16 }
  0x49   :  { %p1010_p4 = scmp.ne.s32.totalorder %s1335_s4, %s1009_s10  ;;  %p1013_p5 = scmp.lt.u32.totalorder %s1009_s10, %s1335_s4 }
  0x4b   :  { %p1015_p6 = pnand %p1013_p5, %p1010_p4 }
  0x4d   :  { %1018 = shalt.err (!%p1015_p6)
}
  0x4e   :  { %s1019_s2 = scalar_lea.vmem %s71_s26, 16  ;;  %s1023_s30 = scalar_lea.vmem %s71_s26, 32 }
  0x4f   :  { %p1020_p7 = scmp.ne.s32.totalorder %s71_s26, %s1019_s2  ;;  %p1024_p8 = scmp.lt.s32.totalorder %s71_s26, %s71_s26 }
  0x50   :  { %p1025_p9 = scmp.lt.s32.totalorder %s1023_s30, %s1019_s2 }
  0x52   :  { %p1026_p10 = por %p1025_p9, %p1024_p8 }
  0x54   :  { %p1027_p11 = pnand %p1026_p10, %p1020_p7 }
  0x56   :  { %1030 = shalt.err (!%p1027_p11)
}
  0x57   :  { %73 = dma.hbm_to_vmem [thread:$0]  %s1335_s4, 16, %s71_s26, [#allocation10]  }
  0x58   :  { %s1031_s19 = scalar_lea.hbm %s1336_s5, 16 }
  0x59   :  { %p1032_p12 = scmp.ne.s32.totalorder %s1336_s5, %s1031_s19  ;;  %p1035_p13 = scmp.lt.u32.totalorder %s1031_s19, %s1336_s5 }
  0x5b   :  { %p1037_p0 = pnand %p1035_p13, %p1032_p12 }
  0x5d   :  { %1040 = shalt.err (!%p1037_p0)
}
  0x5e   :  { %s1041_s24 = scalar_lea.vmem %s81_s29, 16  ;;  %s1045_s1 = scalar_lea.vmem %s81_s29, 32 }
  0x5f   :  { %p1042_p1 = scmp.ne.s32.totalorder %s81_s29, %s1041_s24  ;;  %p1046_p2 = scmp.lt.s32.totalorder %s81_s29, %s81_s29 }
  0x60   :  { %p1047_p3 = scmp.lt.s32.totalorder %s1045_s1, %s1041_s24 }
  0x62   :  { %p1048_p4 = por %p1047_p3, %p1046_p2 }
  0x64   :  { %p1049_p5 = pnand %p1048_p4, %p1042_p1 }
  0x66   :  { %1052 = shalt.err (!%p1049_p5)
}
  0x67   :  { %83 = dma.hbm_to_vmem [thread:$0]  %s1336_s5, 16, %s81_s29, [#allocation13]  }
  0x68   :  { %1075 = dma.done.wait [#allocation4], 1024  }
  0x69   :  { %1076 = vsyncadd [#allocation4], 4294966272 }
  0x6a   :  { %1077 = dma.done.wait [#allocation7], 1040  }
  0x6b   :  { %1078 = vsyncadd [#allocation7], 4294966256 }
  0x6c   :  { %1079 = dma.done.wait [#allocation10], 1040  }
  0x6d   :  { %1080 = vsyncadd [#allocation10], 4294966256 }
  0x6e   :  { %1081 = dma.done.wait [#allocation13], 16  }
  0x6f   :  { %1082 = vsyncadd [#allocation13], 4294967280  ;;  %v897_v0 = vld [vmem:[#allocation6] sm:$0xff]   ;;  %v898_v1 = vld [vmem:[#allocation6 + $0x8] sm:$0xff]   ;;  %vm645_vm0 = vcmask 130112   ;;  %vm652_vm1 = vcmask 195712  }
  0x70   :  { %824 = vmatprep.subr.bf16.mxu0 %v897_v0  ;;  %v899_v2 = vld [vmem:[#allocation6 + $0x10] sm:$0xff]   ;;  %v900_v3 = vld [vmem:[#allocation6 + $0x18] sm:$0xff]   ;;  %v905_v4 = vld [vmem:[#allocation3] sm:$0xff]   ;;  %vm659_vm2 = vcmask 261312   ;;  %vm666_vm3 = vcmask 326912   ;;  %vm673_vm4 = vcmask 392512  }
  0x71   :  { %825 = vmatpush3.bf16.msra.mxu0 %v897_v0  ;;  %840 = vmatprep.mubr.bf16.mxu0 %v905_v4  ;;  %v901_v5 = vld [vmem:[#allocation6 + $0x20] sm:$0xff]   ;;  %v902_v6 = vld [vmem:[#allocation6 + $0x28] sm:$0xff]   ;;  %v903_v9 = vld [vmem:[#allocation6 + $0x30] sm:$0xff]   ;;  %vm680_vm5 = vcmask 458112   ;;  %vm687_vm6 = vcmask 523712   ;;  %vm694_vm7 = vcmask 589312  }
  0x72   :  { %826 = vmatprep.subr.bf16.mxu0 %v898_v1  ;;  %v913_v7 = vld [vmem:[#allocation9] sm:$0xff]   ;;  %v914_v8 = vld [vmem:[#allocation9 + $0x8] sm:$0xff]   ;;  %v915_v10 = vld [vmem:[#allocation9 + $0x10] sm:$0xff]   ;;  %vm701_vm8 = vcmask 654912   ;;  %vm708_vm9 = vcmask 720512   ;;  %vm715_vm10 = vcmask 786112  }
  0x73   :  { %856 = vmatprep.subr.bf16.mxu1 %v913_v7  ;;  %v904_v11 = vld [vmem:[#allocation6 + $0x38] sm:$0xff]   ;;  %v917_v13 = vld [vmem:[#allocation9 + $0x20] sm:$0xff]   ;;  %v907_v15 = vld [vmem:[#allocation3 + $0x10] sm:$0xff]   ;;  %vm722_vm11 = vcmask 851712   ;;  %vm729_vm12 = vcmask 917312   ;;  %vm736_vm13 = vcmask 982912  }
  0x74   :  { %857 = vmatpush3.bf16.msra.mxu1 %v913_v7  ;;  %v916_v12 = vld [vmem:[#allocation9 + $0x18] sm:$0xff]   ;;  %v906_v14 = vld [vmem:[#allocation3 + $0x8] sm:$0xff]   ;;  %v911_v20 = vld [vmem:[#allocation3 + $0x30] sm:$0xff]   ;;  %vm743_vm14 = vcmask 1048512  }
  0x75   :  { %827 = vmatpush3.bf16.msra.mxu0 %v898_v1  ;;  %858 = vmatprep.subr.bf16.mxu1 %v914_v8  ;;  %v918_v16 = vld [vmem:[#allocation9 + $0x28] sm:$0xff]   ;;  %v908_v17 = vld [vmem:[#allocation3 + $0x18] sm:$0xff]   ;;  %v909_v18 = vld [vmem:[#allocation3 + $0x20] sm:$0xff]  }
  0x76   :  { %828 = vmatprep.subr.bf16.mxu0 %v899_v2  ;;  %v910_v19 = vld [vmem:[#allocation3 + $0x28] sm:$0xff]   ;;  %v912_v21 = vld [vmem:[#allocation3 + $0x38] sm:$0xff]   ;;  %v765_v24 = vld [vmem:[#allocation8] ss:$0 sm:$0xff] }
  0x77   :  { %v919_v22 = vld [vmem:[#allocation9 + $0x30] sm:$0xff]   ;;  %v920_v23 = vld [vmem:[#allocation9 + $0x38] sm:$0xff]  }
  0x78   :  { %859 = vmatpush3.bf16.msra.mxu1 %v914_v8 }
  0x79   :  { %829 = vmatpush3.bf16.msra.mxu0 %v899_v2  ;;  %860 = vmatprep.subr.bf16.mxu1 %v915_v10 }
  0x7a   :  { %830 = vmatprep.subr.bf16.mxu0 %v900_v3 }
  0x7c   :  { %861 = vmatpush3.bf16.msra.mxu1 %v915_v10 }
  0x7d   :  { %831 = vmatpush3.bf16.msra.mxu0 %v900_v3  ;;  %862 = vmatprep.subr.bf16.mxu1 %v916_v12 }
  0x7e   :  { %832 = vmatprep.subr.bf16.mxu0 %v901_v5 }
  0x80   :  { %863 = vmatpush3.bf16.msra.mxu1 %v916_v12 }
  0x81   :  { %833 = vmatpush3.bf16.msra.mxu0 %v901_v5  ;;  %864 = vmatprep.subr.bf16.mxu1 %v917_v13 }
  0x82   :  { %834 = vmatprep.subr.bf16.mxu0 %v902_v6 }
  0x84   :  { %865 = vmatpush3.bf16.msra.mxu1 %v917_v13 }
  0x85   :  { %835 = vmatpush3.bf16.msra.mxu0 %v902_v6  ;;  %866 = vmatprep.subr.bf16.mxu1 %v918_v16 }
  0x86   :  { %836 = vmatprep.subr.bf16.mxu0 %v903_v9 }
  0x88   :  { %867 = vmatpush3.bf16.msra.mxu1 %v918_v16 }
  0x89   :  { %837 = vmatpush3.bf16.msra.mxu0 %v903_v9  ;;  %868 = vmatprep.subr.bf16.mxu1 %v919_v22 }
  0x8a   :  { %838 = vmatprep.subr.bf16.mxu0 %v904_v11 }
  0x8c   :  { %869 = vmatpush3.bf16.msra.mxu1 %v919_v22 }
  0x8d   :  { %839 = vmatpush3.bf16.msra.mxu0 %v904_v11  ;;  %870 = vmatprep.subr.bf16.mxu1 %v920_v23 }
  0x90   :  { %841 = vmatmul.mubr.bf16.vlgmr.msra.gmra.mrb[0].mxu0 %v906_v14  ;;  %871 = vmatpush3.bf16.msra.mxu1 %v920_v23  ;;  %v1226_v23 = vld [vmem:[#allocation12] ss:$0 sm:$0xff] }
  0x91   :  { %844 = vmatprep.mubr.bf16.mxu0 %v907_v15 }
  0x98   :  { %845 = vmatmul.mubr.bf16.gmra.mrb[4].mxu0 %v908_v17  ;;  %v1222_v17 = vld [vmem:[#allocation11] ss:$0 sm:$0xff] }
  0x99   :  { %848 = vmatprep.mubr.bf16.mxu0 %v909_v18 }
  0xa0   :  { %849 = vmatmul.mubr.bf16.gmra.mrb[8].mxu0 %v910_v19 }
  0xa1   :  { %852 = vmatprep.mubr.bf16.mxu0 %v911_v20 }
  0xa8   :  { %853 = vmatmul.mubr.bf16.gmra.mrb[12].mxu0 %v912_v21 }
 0x163   :  { %v842_v25 = vpop.f32.mrb[0].mxu0 }
 0x164   :  { %v283_v26 = vadd.f32 %v842_v25, %v765_v24  ;;  %v274_v27 = vpop.f32.mrb[1].mxu0 }
 0x165   :  { %v275_v28 = vadd.f32 %v765_v24, %v274_v27  ;;  %v843_v29 = vpop.f32.mrb[2].mxu0 }
 0x166   :  { %v286_v30 = vadd.f32 %v843_v29, %v765_v24  ;;  %v277_v31 = vpop.f32.mrb[3].mxu0  ;;  %v339_v33 = vmax.f32 %v283_v26, 0.0 }
 0x167   :  { %v278_v32 = vadd.f32 %v765_v24, %v277_v31  ;;  %v337_v35 = vmax.f32 %v275_v28, 0.0 }
 0x168   :  { %v340_v34 = vmax.f32 %v286_v30, 0.0 }
 0x169   :  { %v338_v36 = vmax.f32 %v278_v32, 0.0 }
 0x16a   :  { %v354_v37 = vpack.c.bf16 %v340_v34, %v339_v33 }
 0x16b   :  { %v846_v38 = vpop.f32.mrb[4].mxu0  ;;  %v353_v39 = vpack.c.bf16 %v338_v36, %v337_v35 }
 0x16c   :  { %v299_v40 = vadd.f32 %v846_v38, %v765_v24  ;;  %v290_v41 = vpop.f32.mrb[5].mxu0 }
 0x16d   :  { %v291_v42 = vadd.f32 %v765_v24, %v290_v41  ;;  %v847_v43 = vpop.f32.mrb[6].mxu0  ;;  %872 = vmatprep.mubr.bf16.mxu1 %v353_v39 }
 0x16e   :  { %v302_v44 = vadd.f32 %v847_v43, %v765_v24  ;;  %v293_v45 = vpop.f32.mrb[7].mxu0  ;;  %873 = vmatmul.mubr.bf16.vlgmr.msra.gmra.mrb[0].mxu1 %v354_v37  ;;  %v343_v47 = vmax.f32 %v299_v40, 0.0 }
 0x16f   :  { %v294_v46 = vadd.f32 %v765_v24, %v293_v45  ;;  %v341_v49 = vmax.f32 %v291_v42, 0.0 }
 0x170   :  { %v344_v48 = vmax.f32 %v302_v44, 0.0 }
 0x171   :  { %v342_v50 = vmax.f32 %v294_v46, 0.0 }
 0x172   :  { %v356_v51 = vpack.c.bf16 %v344_v48, %v343_v47 }
 0x173   :  { %v355_v52 = vpack.c.bf16 %v342_v50, %v341_v49  ;;  %v850_v53 = vpop.f32.mrb[8].mxu0 }
 0x174   :  { %v315_v54 = vadd.f32 %v850_v53, %v765_v24  ;;  %v306_v55 = vpop.f32.mrb[9].mxu0 }
 0x175   :  { %v307_v56 = vadd.f32 %v765_v24, %v306_v55  ;;  %v851_v57 = vpop.f32.mrb[10].mxu0  ;;  %876 = vmatprep.mubr.bf16.mxu1 %v355_v52 }
 0x176   :  { %v318_v58 = vadd.f32 %v851_v57, %v765_v24  ;;  %v309_v59 = vpop.f32.mrb[11].mxu0  ;;  %877 = vmatmul.mubr.bf16.gmra.mrb[4].mxu1 %v356_v51  ;;  %v347_v61 = vmax.f32 %v315_v54, 0.0 }
 0x177   :  { %v310_v60 = vadd.f32 %v765_v24, %v309_v59  ;;  %v345_v63 = vmax.f32 %v307_v56, 0.0 }
 0x178   :  { %v348_v62 = vmax.f32 %v318_v58, 0.0 }
 0x179   :  { %v346_v0 = vmax.f32 %v310_v60, 0.0 }
 0x17a   :  { %v358_v1 = vpack.c.bf16 %v348_v62, %v347_v61 }
 0x17b   :  { %v357_v2 = vpack.c.bf16 %v346_v0, %v345_v63  ;;  %v854_v3 = vpop.f32.mrb[12].mxu0 }
 0x17c   :  { %v331_v4 = vadd.f32 %v854_v3, %v765_v24  ;;  %v322_v5 = vpop.f32.mrb[13].mxu0 }
 0x17d   :  { %v323_v6 = vadd.f32 %v765_v24, %v322_v5  ;;  %v855_v7 = vpop.f32.mrb[14].mxu0  ;;  %880 = vmatprep.mubr.bf16.mxu1 %v357_v2 }
 0x17e   :  { %v334_v8 = vadd.f32 %v855_v7, %v765_v24  ;;  %v325_v9 = vpop.f32.mrb[15].mxu0  ;;  %881 = vmatmul.mubr.bf16.gmra.mrb[8].mxu1 %v358_v1  ;;  %v351_v11 = vmax.f32 %v331_v4, 0.0 }
 0x17f   :  { %v326_v10 = vadd.f32 %v765_v24, %v325_v9  ;;  %v349_v13 = vmax.f32 %v323_v6, 0.0 }
 0x180   :  { %v352_v12 = vmax.f32 %v334_v8, 0.0 }
 0x181   :  { %v350_v14 = vmax.f32 %v326_v10, 0.0 }
 0x182   :  { %v360_v15 = vpack.c.bf16 %v352_v12, %v351_v11 }
 0x183   :  { %v359_v16 = vpack.c.bf16 %v350_v14, %v349_v13 }
 0x185   :  { %884 = vmatprep.mubr.bf16.mxu1 %v359_v16 }
 0x186   :  { %885 = vmatmul.mubr.bf16.gmra.mrb[12].mxu1 %v360_v15 }
 0x241   :  { %v874_v18 = vpop.f32.mrb[0].mxu1 }
 0x242   :  { %v475_v19 = vadd.f32 %v874_v18, %v1222_v17  ;;  %v466_v20 = vpop.f32.mrb[1].mxu1 }
 0x243   :  { %v467_v21 = vadd.f32 %v1222_v17, %v466_v20  ;;  %v875_v22 = vpop.f32.mrb[2].mxu1  ;;  %v634_v20 = vlaneseq }
 0x244   :  { %v531_v24 = vmax.f32 %v475_v19, 0.0  ;;  %v478_v25 = vadd.f32 %v875_v22, %v1222_v17  ;;  %v469_v26 = vpop.f32.mrb[3].mxu1 }
 0x245   :  { %v529_v27 = vmax.f32 %v467_v21, 0.0  ;;  %v470_v28 = vadd.f32 %v1222_v17, %v469_v26  ;;  %v1258_v21 = vand.u32 127, %v634_v20  ;;  %v1266_v26 = vstv %s1337_s6  ;;  %s1093_s6 = smov [#allocation14]  }
 0x246   :  { %v532_v29 = vmax.f32 %v478_v25, 0.0  ;;  %v554_v30 = vmul.f32 %v1226_v23, %v531_v24  ;;  %v1261_v24 = vshrl.u32 %v634_v20, 7  ;;  %s753_s13 = sshll.u32 %s1093_s6, 4  ;;  %s754_s13 = int_to_ptr.vmem [resolvable:$true] %s753_s13 }
 0x247   :  { %v530_v31 = vmax.f32 %v470_v28, 0.0  ;;  %v552_v32 = vmul.f32 %v1226_v23, %v529_v27  ;;  %v640_v22 = vadd.s32 4294967288, %v1258_v21  ;;  %v647_v27 = vadd.s32 4294967280, %v1258_v21  ;;  %s1053_s14 = scalar_lea.vmem %s754_s13, 16  ;;  %s1057_s26 = scalar_lea.vmem %s754_s13, 32 }
 0x248   :  { %572 = vadd.xlane.f32.xlu1 %v554_v30  ;;  %v555_v36 = vmul.f32 %v1226_v23, %v532_v29  ;;  %p1054_p6 = scmp.ne.s32.totalorder %s754_s13, %s1053_s14  ;;  %p1058_p7 = scmp.lt.s32.totalorder %s754_s13, %s754_s13 }
 0x249   :  { %v878_v33 = vpop.f32.mrb[4].mxu1  ;;  %568 = vadd.xlane.f32.xlu0 %v552_v32  ;;  %v553_v39 = vmul.f32 %v1226_v23, %v530_v31  ;;  %v643_v28 = vsub.s32 %v640_v22, %v1261_v24  ;;  %p1059_p8 = scmp.lt.s32.totalorder %s1057_s26, %s1053_s14 }
 0x24a   :  { %v491_v34 = vadd.f32 %v878_v33, %v1222_v17  ;;  %v482_v35 = vpop.f32.mrb[5].mxu1  ;;  %v650_v33 = vsub.s32 %v647_v27, %v1261_v24 }
 0x24b   :  { %v483_v37 = vadd.f32 %v1222_v17, %v482_v35  ;;  %v879_v38 = vpop.f32.mrb[6].mxu1  ;;  %p1060_p9 = por %p1059_p8, %p1058_p7 }
 0x24c   :  { %v535_v40 = vmax.f32 %v491_v34, 0.0  ;;  %v494_v41 = vadd.f32 %v879_v38, %v1222_v17  ;;  %574 = vadd.xlane.f32.xlu1 %v555_v36  ;;  %v485_v42 = vpop.f32.mrb[7].mxu1  ;;  %v654_v34 = vadd.s32 4294967272, %v1258_v21 }
 0x24d   :  { %v486_v43 = vadd.f32 %v1222_v17, %v485_v42  ;;  %570 = vadd.xlane.f32.xlu0 %v553_v39  ;;  %v533_v46 = vmax.f32 %v483_v37, 0.0  ;;  %v661_v37 = vadd.s32 4294967264, %v1258_v21  ;;  %p1061_p10 = pnand %p1060_p9, %p1054_p6 }
 0x24e   :  { %v536_v44 = vmax.f32 %v494_v41, 0.0  ;;  %v558_v45 = vmul.f32 %v1226_v23, %v535_v40  ;;  %v668_v40 = vadd.s32 4294967256, %v1258_v21  ;;  %v675_v41 = vadd.s32 4294967248, %v1258_v21 }
 0x24f   :  { %v534_v47 = vmax.f32 %v486_v43, 0.0  ;;  %v556_v54 = vmul.f32 %v1226_v23, %v533_v46  ;;  %v657_v43 = vsub.s32 %v654_v34, %v1261_v24 }
 0x250   :  { %v559_v48 = vmul.f32 %v1226_v23, %v536_v44 }
 0x251   :  { %v882_v49 = vpop.f32.mrb[8].mxu1  ;;  %580 = vadd.xlane.f32.xlu0 %v558_v45  ;;  %v557_v58 = vmul.f32 %v1226_v23, %v534_v47  ;;  %v664_v47 = vsub.s32 %v661_v37, %v1261_v24 }
 0x252   :  { %v507_v50 = vadd.f32 %v882_v49, %v1222_v17  ;;  %582 = vadd.xlane.f32.xlu1 %v559_v48  ;;  %v498_v51 = vpop.f32.mrb[9].mxu1  ;;  %v682_v48 = vadd.s32 4294967240, %v1258_v21 }
 0x253   :  { %v499_v52 = vadd.f32 %v1222_v17, %v498_v51  ;;  %v883_v53 = vpop.f32.mrb[10].mxu1 }
 0x254   :  { %v539_v55 = vmax.f32 %v507_v50, 0.0  ;;  %v510_v56 = vadd.f32 %v883_v53, %v1222_v17  ;;  %v501_v57 = vpop.f32.mrb[11].mxu1  ;;  %v671_v50 = vsub.s32 %v668_v40, %v1261_v24 }
 0x255   :  { %v502_v59 = vadd.f32 %v1222_v17, %v501_v57  ;;  %576 = vadd.xlane.f32.xlu0 %v556_v54  ;;  %v537_v62 = vmax.f32 %v499_v52, 0.0  ;;  %v678_v52 = vsub.s32 %v675_v41, %v1261_v24  ;;  %v703_v57 = vadd.s32 4294967216, %v1258_v21 }
 0x256   :  { %v540_v60 = vmax.f32 %v510_v56, 0.0  ;;  %578 = vadd.xlane.f32.xlu1 %v557_v58  ;;  %v562_v61 = vmul.f32 %v1226_v23, %v539_v55 }
 0x257   :  { %v538_v63 = vmax.f32 %v502_v59, 0.0  ;;  %v560_v6 = vmul.f32 %v1226_v23, %v537_v62 }
 0x258   :  { %v563_v0 = vmul.f32 %v1226_v23, %v540_v60  ;;  %v689_v60 = vadd.s32 4294967232, %v1258_v21 }
 0x259   :  { %v886_v1 = vpop.f32.mrb[12].mxu1  ;;  %588 = vadd.xlane.f32.xlu0 %v562_v61  ;;  %v561_v8 = vmul.f32 %v1226_v23, %v538_v63 }
 0x25a   :  { %v514_v2 = vpop.f32.mrb[13].mxu1  ;;  %590 = vadd.xlane.f32.xlu1 %v563_v0  ;;  %v523_v3 = vadd.f32 %v886_v1, %v1222_v17  ;;  %v710_v0 = vadd.s32 4294967208, %v1258_v21  ;;  %v696_v1 = vadd.s32 4294967224, %v1258_v21 }
 0x25b   :  { %v515_v4 = vadd.f32 %v1222_v17, %v514_v2  ;;  %v887_v5 = vpop.f32.mrb[14].mxu1 }
 0x25c   :  { %v517_v7 = vpop.f32.mrb[15].mxu1  ;;  %v526_v10 = vadd.f32 %v887_v5, %v1222_v17  ;;  %v543_v12 = vmax.f32 %v523_v3, 0.0 }
 0x25d   :  { %v541_v9 = vmax.f32 %v515_v4, 0.0  ;;  %v518_v11 = vadd.f32 %v1222_v17, %v517_v7  ;;  %584 = vadd.xlane.f32.xlu0 %v560_v6  ;;  %v685_v4 = vsub.s32 %v682_v48, %v1261_v24 }
 0x25e   :  { %586 = vadd.xlane.f32.xlu1 %v561_v8  ;;  %v544_v15 = vmax.f32 %v526_v10, 0.0  ;;  %v566_v18 = vmul.f32 %v1226_v23, %v543_v12  ;;  %v706_v8 = vsub.s32 %v703_v57, %v1261_v24  ;;  %v717_v10 = vadd.s32 4294967200, %v1258_v21 }
 0x25f   :  { %v542_v13 = vmax.f32 %v518_v11, 0.0  ;;  %v564_v14 = vmul.f32 %v1226_v23, %v541_v9  ;;  %v692_v9 = vsub.s32 %v689_v60, %v1261_v24  ;;  %v713_v11 = vsub.s32 %v710_v0, %v1261_v24 }
 0x260   :  { %v567_v19 = vmul.f32 %v1226_v23, %v544_v15  ;;  %v720_v27 = vsub.s32 %v717_v10, %v1261_v24 }
 0x261   :  { %592 = vadd.xlane.f32.xlu0 %v564_v14  ;;  %v565_v16 = vmul.f32 %v1226_v23, %v542_v13  ;;  %v638_v23 = vsub.s32 %v1258_v21, %v1261_v24  ;;  %v699_v13 = vsub.s32 %v696_v1, %v1261_v24  ;;  %v724_v14 = vadd.s32 4294967192, %v1258_v21 }
 0x263   :  { %594 = vadd.xlane.f32.xlu1 %v565_v16 }
 0x265   :  { %596 = vadd.xlane.f32.xlu0 %v566_v18 }
 0x267   :  { %598 = vadd.xlane.f32.xlu1 %v567_v19 }
 0x2d5   :  { %v573_v17 = vpop.xlane.xlu1 %572 }
 0x2d6   :  { %v569_v25 = vpop.xlane.xlu0 %568  ;;  %v604_v35 = vadd.f32 %v1266_v26, %v573_v17 }
 0x2d7   :  { %v602_v29 = vadd.f32 %v1266_v26, %v569_v25 }
 0x2d8   :  { %v651_v46 = vrot.slane %v604_v35, %v650_v33  ;;  %v738_v35 = vadd.s32 4294967176, %v1258_v21 }
 0x2d9   :  { %v575_v31 = vpop.xlane.xlu1 %574  ;;  %v639_v38 = vrot.slane %v602_v29, %v638_v23 }
 0x2da   :  { %v571_v30 = vpop.xlane.xlu0 %570  ;;  %v605_v44 = vadd.f32 %v1266_v26, %v575_v31  ;;  %v727_v31 = vsub.s32 %v724_v14, %v1261_v24 }
 0x2db   :  { %v603_v32 = vadd.f32 %v1266_v26, %v571_v30 }
 0x2dc   :  { %v658_v55 = vrot.slane %v605_v44, %v657_v43 }
 0x2dd   :  { %v644_v36 = vrot.slane %v603_v32, %v643_v28  ;;  %v731_v28 = vadd.s32 4294967184, %v1258_v21  ;;  %v741_v21 = vsub.s32 %v738_v35, %v1261_v24 }
 0x2de   :  { %v581_v39 = vpop.xlane.xlu0 %580 }
 0x2df   :  { %v583_v42 = vpop.xlane.xlu1 %582  ;;  %v646_v45 = vsel %vm645_vm0, %v644_v36, %v639_v38  ;;  %v608_v58 = vadd.f32 %v1266_v26, %v581_v39 }
 0x2e0   :  { %v653_v51 = vsel %vm652_vm1, %v651_v46, %v646_v45  ;;  %v609_v5 = vadd.f32 %v1266_v26, %v583_v42  ;;  %v734_v42 = vsub.s32 %v731_v28, %v1261_v24 }
 0x2e1   :  { %v660_v61 = vsel %vm659_vm2, %v658_v55, %v653_v51  ;;  %v679_v7 = vrot.slane %v608_v58, %v678_v52 }
 0x2e2   :  { %v577_v49 = vpop.xlane.xlu0 %576  ;;  %v686_v20 = vrot.slane %v609_v5, %v685_v4 }
 0x2e3   :  { %v606_v53 = vadd.f32 %v1266_v26, %v577_v49  ;;  %v579_v54 = vpop.xlane.xlu1 %578 }
 0x2e4   :  { %v607_v56 = vadd.f32 %v1266_v26, %v579_v54 }
 0x2e5   :  { %v665_v59 = vrot.slane %v606_v53, %v664_v47 }
 0x2e6   :  { %v672_v62 = vrot.slane %v607_v56, %v671_v50  ;;  %v589_v63 = vpop.xlane.xlu0 %588 }
 0x2e7   :  { %v667_v2 = vsel %vm666_vm3, %v665_v59, %v660_v61  ;;  %v591_v3 = vpop.xlane.xlu1 %590  ;;  %v612_v16 = vadd.f32 %v1266_v26, %v589_v63 }
 0x2e8   :  { %v674_v6 = vsel %vm673_vm4, %v672_v62, %v667_v2  ;;  %v613_v17 = vadd.f32 %v1266_v26, %v591_v3 }
 0x2e9   :  { %v681_v15 = vsel %vm680_vm5, %v679_v7, %v674_v6  ;;  %v707_v32 = vrot.slane %v612_v16, %v706_v8 }
 0x2ea   :  { %v585_v12 = vpop.xlane.xlu0 %584  ;;  %v688_v23 = vsel %vm687_vm6, %v686_v20, %v681_v15  ;;  %v714_v36 = vrot.slane %v613_v17, %v713_v11 }
 0x2eb   :  { %v610_v18 = vadd.f32 %v1266_v26, %v585_v12  ;;  %v587_v19 = vpop.xlane.xlu1 %586 }
 0x2ec   :  { %v611_v22 = vadd.f32 %v1266_v26, %v587_v19 }
 0x2ed   :  { %v693_v25 = vrot.slane %v610_v18, %v692_v9 }
 0x2ee   :  { %v700_v29 = vrot.slane %v611_v22, %v699_v13  ;;  %v593_v30 = vpop.xlane.xlu0 %592 }
 0x2ef   :  { %v695_v33 = vsel %vm694_vm7, %v693_v25, %v688_v23  ;;  %v614_v34 = vadd.f32 %v1266_v26, %v593_v30 }
 0x2f0   :  { %v702_v37 = vsel %vm701_vm8, %v700_v29, %v695_v33  ;;  %v595_v38 = vpop.xlane.xlu1 %594 }
 0x2f1   :  { %v709_v39 = vsel %vm708_vm9, %v707_v32, %v702_v37  ;;  %v721_v40 = vrot.slane %v614_v34, %v720_v27  ;;  %v615_v41 = vadd.f32 %v1266_v26, %v595_v38 }
 0x2f2   :  { %v716_v43 = vsel %vm715_vm10, %v714_v36, %v709_v39  ;;  %v597_v44 = vpop.xlane.xlu0 %596 }
 0x2f3   :  { %v723_v45 = vsel %vm722_vm11, %v721_v40, %v716_v43  ;;  %v728_v46 = vrot.slane %v615_v41, %v727_v31  ;;  %v616_v47 = vadd.f32 %v1266_v26, %v597_v44 }
 0x2f4   :  { %v599_v48 = vpop.xlane.xlu1 %598 }
 0x2f5   :  { %v730_v49 = vsel %vm729_vm12, %v728_v46, %v723_v45  ;;  %v735_v50 = vrot.slane %v616_v47, %v734_v42  ;;  %v617_v51 = vadd.f32 %v1266_v26, %v599_v48 }
 0x2f7   :  { %v742_v52 = vrot.slane %v617_v51, %v741_v21  ;;  %v737_v53 = vsel %vm736_vm13, %v735_v50, %v730_v49 }
 0x2f9   :  { %v744_v54 = vsel %vm743_vm14, %v742_v52, %v737_v53 }
 0x2fa   :  { %746 = vst [vmem:[#allocation14] sm:$0x1] %v744_v54 }
 0x2fb   :  { %1064 = shalt.err (!%p1061_p10)
}
 0x2fc   :  { %s1065_s8 = scalar_lea.hbm %s1338_s7, 16 }
 0x2fd   :  { %p1066_p11 = scmp.ne.s32.totalorder %s1338_s7, %s1065_s8  ;;  %p1069_p12 = scmp.lt.u32.totalorder %s1065_s8, %s1338_s7 }
 0x2ff   :  { %p1071_p13 = pnand %p1069_p12, %p1066_p11 }
 0x301   :  { %1074 = shalt.err (!%p1071_p13)
}
 0x302   :  { %756 = dma.vmem_to_hbm [thread:$0]  %s754_s13, 16, %s1338_s7, [#allocation5]  }
 0x303   :  { %1083 = dma.done.wait [#allocation5], 16  }
 0x304   :  { %1084 = vsyncadd [#allocation5], 4294967280 }
 0x305   :  { %760 = vsyncpa [#allocation4], 1 }
 0x306   :  { %761 = vsyncpa [#allocation7], 1 }
 0x307   :  { %762 = vsyncpa [#allocation10], 1 }
 0x308   :  { %763 = vsyncpa [#allocation13], 1 }
 0x309   :  { %764 = vsyncpa [#allocation5], 1 }

</bundles_post_ra>
